<compile_context>
chip_gen: v5e
topology: v5e:2x2
jax: 0.10.0
libtpu: 0.0.40
codegen_flags: <defaults>
</compile_context>

<pallas_src>
import jax
import jax.numpy as jnp
from jax.experimental import pallas as pl
from jax.experimental.pallas import tpu as pltpu


def _round_up(v, m):
    return ((v + m - 1) // m) * m


def _cdiv(a, b):
    return -(-a // b)


def _ffn_kernel(x_ref, w1t_ref, b1_ref, w2t_ref, b2_ref, o_ref):
    x = x_ref[...]                                       # (tm, H), x.dtype
    x_mxu = x.astype(w1t_ref.dtype)                      # MXU operand dtype
    # conv1 (k=1): x @ W1^T (W1 pre-transposed in the wrapper), f32 accumulate.
    h = jnp.dot(x_mxu, w1t_ref[...], preferred_element_type=jnp.float32)
    h = jnp.maximum(h + b1_ref[...], 0.0)                # bias + ReLU
    # dropout1 / dropout2: identity at inference.
    # TODO(synk): train-mode dropout (pltpu.prng_seed / prng_random_bits) omitted.
    h = h.astype(w2t_ref.dtype)                          # back to MXU dtype
    # conv2 (k=1): h @ W2^T, f32 accumulate.
    y = jnp.dot(h, w2t_ref[...], preferred_element_type=jnp.float32)
    y = y + b2_ref[...] + x.astype(jnp.float32)          # bias + f32 residual
    o_ref[...] = y.astype(o_ref.dtype)                   # output cast in epilogue


def pointwise_ffn(x, w1, b1, w2, b2, *, tm=1024, compute_dtype=None,
                  vmem_limit_bytes=None):
    """SASRec PointWiseFeedForward forward pass.

    x       : (B, L, H) activations.
    w1, w2  : (H, H) Conv1d(H, H, 1) weights with the kernel dim squeezed
              (PyTorch layout: (H_out, H_in)).
    b1, b2  : (H,) biases.
    Returns (B, L, H) in x.dtype.
    """
    B, L, H = x.shape
    N = B * L

    # MXU operand dtype: bf16 by default once the matmuls are big enough for
    # compute to matter (critical on v5e, which has no native f32 MXU path).
    if compute_dtype is None:
        cdt = jnp.bfloat16 if H >= 512 else x.dtype
    else:
        cdt = jnp.dtype(compute_dtype)

    # Row tile: big enough that each grid step beats the ~0.35us fixed per-step
    # overhead, clamped for small N, and split into >= 2 steps when possible so
    # a v7x megacore can give both TensorCores work.
    tm_eff = max(8, min(tm, _round_up(N, 8)))
    if N > 8 and _cdiv(N, tm_eff) < 2:
        tm_eff = _round_up(_cdiv(N, 2), 8)
    grid = (_cdiv(N, tm_eff),)

    x2 = x.reshape(N, H)                        # metadata-only reshape
    # Pre-transpose + cast the (small) weights once, outside the grid loop.
    w1t = w1.T.astype(cdt)
    w2t = w2.T.astype(cdt)
    b1r = b1.astype(jnp.float32).reshape(1, H)  # added to the f32 accumulator
    b2r = b2.astype(jnp.float32).reshape(1, H)

    x_esize = jnp.dtype(x.dtype).itemsize
    w_esize = jnp.dtype(cdt).itemsize

    if vmem_limit_bytes is None:
        # double-buffered x/out + (conservatively double-buffered) weights +
        # f32 intermediates, +25% headroom.
        # TODO(synk): for H ~ 2048+ in f32 the resident weights outgrow v7x's
        # 64 MiB VMEM; that regime needs a second grid axis tiling W's output
        # dim (not implemented here).
        io = 2 * 2 * tm_eff * H * x_esize
        weights = 2 * 2 * H * H * w_esize + 2 * 2 * H * 4
        scratch = tm_eff * H * (4 + 4 + w_esize)
        vmem_limit_bytes = int(1.25 * (io + weights + scratch))
        vmem_limit_bytes = min(max(vmem_limit_bytes, 16 * 2**20), 64 * 2**20)

    cost = pl.CostEstimate(
        flops=4 * N * H * H,                     # two matmuls
        transcendentals=0,
        bytes_accessed=2 * N * H * x_esize + 2 * H * H * w_esize + 2 * H * 4,
    )

    x_spec = pl.BlockSpec((tm_eff, H), lambda i: (i, 0))
    out_spec = pl.BlockSpec((tm_eff, H), lambda i: (i, 0))

    def _run(single_buffer_weights):
        const_kwargs = (
            dict(pipeline_mode=pl.Buffered(1)) if single_buffer_weights else {}
        )
        w_spec = pl.BlockSpec((H, H), lambda i: (0, 0), **const_kwargs)
        b_spec = pl.BlockSpec((1, H), lambda i: (0, 0), **const_kwargs)
        return pl.pallas_call(
            _ffn_kernel,
            out_shape=jax.ShapeDtypeStruct((N, H), x.dtype),
            grid_spec=pltpu.PrefetchScalarGridSpec(
                num_scalar_prefetch=0,
                grid=grid,
                in_specs=[x_spec, w_spec, b_spec, w_spec, b_spec],
                out_specs=out_spec,
            ),
            compiler_params=pltpu.CompilerParams(
                dimension_semantics=("parallel",),
                vmem_limit_bytes=vmem_limit_bytes,
            ),
            cost_estimate=cost,
        )(x2, w1t, b1r, w2t, b2r)

    try:
        # Grid-invariant operands: single-buffer (halves their VMEM footprint).
        out = _run(single_buffer_weights=True)
    except Exception:
        # pl.Buffered(1) unsupported on this jax version -> default buffering.
        out = _run(single_buffer_weights=False)

    return out.reshape(B, L, H)


if __name__ == "__main__":
    B, L, H = 2, 8, 32
    key = jax.random.PRNGKey(0)
    kx, k1, k2, k3, k4 = jax.random.split(key, 5)

    x = jax.random.normal(kx, (B, L, H), dtype=jnp.float32)
    # Conv1d(H, H, 1) weights: PyTorch (H_out, H_in, 1) squeezed to (H, H).
    w1 = jax.random.normal(k1, (H, H), dtype=jnp.float32) * 0.05
    b1 = jax.random.normal(k2, (H,), dtype=jnp.float32) * 0.05
    w2 = jax.random.normal(k3, (H, H), dtype=jnp.float32) * 0.05
    b2 = jax.random.normal(k4, (H,), dtype=jnp.float32) * 0.05

    def ref_fn(xx):
        hh = jnp.maximum(jnp.einsum("blh,oh->blo", xx, w1) + b1, 0.0)
        return jnp.einsum("blh,oh->blo", hh, w2) + b2 + xx

    # f32 path (H < 512 -> f32 MXU operands by default).
    y = pointwise_ffn(x, w1, b1, w2, b2)
    jax.block_until_ready(y)
    y_ref = ref_fn(x)
    assert y.shape == y_ref.shape and y.dtype == x.dtype
    assert jnp.allclose(y, y_ref, atol=1e-5, rtol=1e-5)

    # Ragged token count: exercises the masked overhung last grid block.
    xr = jax.random.normal(jax.random.PRNGKey(1), (3, 5, H), dtype=jnp.float32)
    yr = pointwise_ffn(xr, w1, b1, w2, b2)
    jax.block_until_ready(yr)
    assert jnp.allclose(yr, ref_fn(xr), atol=1e-5, rtol=1e-5)

    # bf16 MXU-operand path: residual stays f32, output stays x.dtype.
    y_bf16 = pointwise_ffn(x, w1, b1, w2, b2, compute_dtype=jnp.bfloat16)
    jax.block_until_ready(y_bf16)
    assert y_bf16.dtype == x.dtype
    assert jnp.allclose(y_bf16, y_ref, atol=3e-2, rtol=3e-2)

    print("KERNEL_OK")
</pallas_src>

<mosaic_0001>
module attributes {stable_mosaic.version = 11 : i64} {
  func.func @_ffn_kernel(%arg0: i32, %arg1: memref<8x32xf32, #tpu.memory_space<vmem>>, %arg2: memref<32x32xf32, #tpu.memory_space<vmem>>, %arg3: memref<1x32xf32, #tpu.memory_space<vmem>>, %arg4: memref<32x32xf32, #tpu.memory_space<vmem>>, %arg5: memref<1x32xf32, #tpu.memory_space<vmem>>, %arg6: memref<8x32xf32, #tpu.memory_space<vmem>>) attributes {dimension_semantics = [#tpu.dimension_semantics<parallel>], iteration_bounds = array<i64: 2>, scalar_prefetch = 0 : i64, scratch_operands = 0 : i64, tpu.core_type = #tpu.core_type<tc>, window_params = [{transform_indices = @transform_0, window_bounds = array<i64: 8, 32>}, {pipeline_mode = #tpu.pipeline_mode<synchronous>, transform_indices = @transform_1, window_bounds = array<i64: 32, 32>}, {pipeline_mode = #tpu.pipeline_mode<synchronous>, transform_indices = @transform_2, window_bounds = array<i64: 1, 32>}, {pipeline_mode = #tpu.pipeline_mode<synchronous>, transform_indices = @transform_3, window_bounds = array<i64: 32, 32>}, {pipeline_mode = #tpu.pipeline_mode<synchronous>, transform_indices = @transform_4, window_bounds = array<i64: 1, 32>}, {transform_indices = @transform_5, window_bounds = array<i64: 8, 32>}]} {
    %c0 = arith.constant 0 : index
    %c0_0 = arith.constant 0 : index
    %0 = vector.load %arg1[%c0, %c0_0] : memref<8x32xf32, #tpu.memory_space<vmem>>, vector<8x32xf32>
    %c0_1 = arith.constant 0 : index
    %c0_2 = arith.constant 0 : index
    %1 = vector.load %arg2[%c0_1, %c0_2] : memref<32x32xf32, #tpu.memory_space<vmem>>, vector<32x32xf32>
    %cst = arith.constant dense<0.000000e+00> : vector<8x32xf32>
    %2 = tpu.matmul %0, %1, %cst {dimension_numbers = #tpu.dot_dimension_numbers<[1], [0], [0], [1], [0, 0, 1, 1], [], []>} : vector<8x32xf32>, vector<32x32xf32>, vector<8x32xf32> -> vector<8x32xf32>
    %c0_3 = arith.constant 0 : index
    %c0_4 = arith.constant 0 : index
    %3 = vector.load %arg3[%c0_3, %c0_4] : memref<1x32xf32, #tpu.memory_space<vmem>>, vector<1x32xf32>
    %4 = vector.broadcast %3 : vector<1x32xf32> to vector<8x32xf32>
    %5 = arith.addf %2, %4 : vector<8x32xf32>
    %cst_5 = arith.constant 0.000000e+00 : f32
    %6 = vector.broadcast %cst_5 : f32 to vector<8x32xf32>
    %7 = arith.maximumf %5, %6 : vector<8x32xf32>
    %c0_6 = arith.constant 0 : index
    %c0_7 = arith.constant 0 : index
    %8 = vector.load %arg4[%c0_6, %c0_7] : memref<32x32xf32, #tpu.memory_space<vmem>>, vector<32x32xf32>
    %cst_8 = arith.constant dense<0.000000e+00> : vector<8x32xf32>
    %9 = tpu.matmul %7, %8, %cst_8 {dimension_numbers = #tpu.dot_dimension_numbers<[1], [0], [0], [1], [0, 0, 1, 1], [], []>} : vector<8x32xf32>, vector<32x32xf32>, vector<8x32xf32> -> vector<8x32xf32>
    %c0_9 = arith.constant 0 : index
    %c0_10 = arith.constant 0 : index
    %10 = vector.load %arg5[%c0_9, %c0_10] : memref<1x32xf32, #tpu.memory_space<vmem>>, vector<1x32xf32>
    %11 = vector.broadcast %10 : vector<1x32xf32> to vector<8x32xf32>
    %12 = arith.addf %9, %11 : vector<8x32xf32>
    %13 = arith.addf %12, %0 : vector<8x32xf32>
    %c0_11 = arith.constant 0 : index
    %c0_12 = arith.constant 0 : index
    %14 = vector.load %arg6[%c0_11, %c0_12] : memref<8x32xf32, #tpu.memory_space<vmem>>, vector<8x32xf32>
    tpu.vector_store %arg6[%c0_11, %c0_12], %13 {strides = array<i32>} : memref<8x32xf32, #tpu.memory_space<vmem>>, vector<8x32xf32>,
    return
  }
  func.func @transform_0(%arg0: i32) -> (i32, i32) {
    %c0_i32 = arith.constant 0 : i32
    %c0_i32_0 = arith.constant 0 : i32
    return %arg0, %c0_i32 : i32, i32
  }
  func.func @transform_1(%arg0: i32) -> (i32, i32) {
    %c0_i32 = arith.constant 0 : i32
    %c0_i32_0 = arith.constant 0 : i32
    %c0_i32_1 = arith.constant 0 : i32
    return %c0_i32, %c0_i32_0 : i32, i32
  }
  func.func @transform_2(%arg0: i32) -> (i32, i32) {
    %c0_i32 = arith.constant 0 : i32
    %c0_i32_0 = arith.constant 0 : i32
    %c0_i32_1 = arith.constant 0 : i32
    return %c0_i32, %c0_i32_0 : i32, i32
  }
  func.func @transform_3(%arg0: i32) -> (i32, i32) {
    %c0_i32 = arith.constant 0 : i32
    %c0_i32_0 = arith.constant 0 : i32
    %c0_i32_1 = arith.constant 0 : i32
    return %c0_i32, %c0_i32_0 : i32, i32
  }
  func.func @transform_4(%arg0: i32) -> (i32, i32) {
    %c0_i32 = arith.constant 0 : i32
    %c0_i32_0 = arith.constant 0 : i32
    %c0_i32_1 = arith.constant 0 : i32
    return %c0_i32, %c0_i32_0 : i32, i32
  }
  func.func @transform_5(%arg0: i32) -> (i32, i32) {
    %c0_i32 = arith.constant 0 : i32
    %c0_i32_0 = arith.constant 0 : i32
    return %arg0, %c0_i32 : i32, i32
  }
}

module attributes {stable_mosaic.version = 11 : i64} {
  func.func @_ffn_kernel(%arg0: i32, %arg1: memref<8x32xf32, #tpu.memory_space<vmem>>, %arg2: memref<32x32xf32, #tpu.memory_space<vmem>>, %arg3: memref<1x32xf32, #tpu.memory_space<vmem>>, %arg4: memref<32x32xf32, #tpu.memory_space<vmem>>, %arg5: memref<1x32xf32, #tpu.memory_space<vmem>>, %arg6: memref<8x32xf32, #tpu.memory_space<vmem>>) attributes {dimension_semantics = [#tpu.dimension_semantics<parallel>], iteration_bounds = array<i64: 2>, scalar_prefetch = 0 : i64, scratch_operands = 0 : i64, tpu.core_type = #tpu.core_type<tc>, window_params = [{transform_indices = @transform_0, window_bounds = array<i64: 8, 32>}, {pipeline_mode = #tpu.pipeline_mode<synchronous>, transform_indices = @transform_1, window_bounds = array<i64: 32, 32>}, {pipeline_mode = #tpu.pipeline_mode<synchronous>, transform_indices = @transform_2, window_bounds = array<i64: 1, 32>}, {pipeline_mode = #tpu.pipeline_mode<synchronous>, transform_indices = @transform_3, window_bounds = array<i64: 32, 32>}, {pipeline_mode = #tpu.pipeline_mode<synchronous>, transform_indices = @transform_4, window_bounds = array<i64: 1, 32>}, {transform_indices = @transform_5, window_bounds = array<i64: 8, 32>}]} {
    %c0 = arith.constant 0 : index
    %c0_0 = arith.constant 0 : index
    %0 = vector.load %arg1[%c0, %c0_0] : memref<8x32xf32, #tpu.memory_space<vmem>>, vector<8x32xf32>
    %c0_1 = arith.constant 0 : index
    %c0_2 = arith.constant 0 : index
    %1 = vector.load %arg2[%c0_1, %c0_2] : memref<32x32xf32, #tpu.memory_space<vmem>>, vector<32x32xf32>
    %cst = arith.constant dense<0.000000e+00> : vector<8x32xf32>
    %2 = tpu.matmul %0, %1, %cst {dimension_numbers = #tpu.dot_dimension_numbers<[1], [0], [0], [1], [0, 0, 1, 1], [], []>} : vector<8x32xf32>, vector<32x32xf32>, vector<8x32xf32> -> vector<8x32xf32>
    %c0_3 = arith.constant 0 : index
    %c0_4 = arith.constant 0 : index
    %3 = vector.load %arg3[%c0_3, %c0_4] : memref<1x32xf32, #tpu.memory_space<vmem>>, vector<1x32xf32>
    %4 = vector.broadcast %3 : vector<1x32xf32> to vector<8x32xf32>
    %5 = arith.addf %2, %4 : vector<8x32xf32>
    %cst_5 = arith.constant 0.000000e+00 : f32
    %6 = vector.broadcast %cst_5 : f32 to vector<8x32xf32>
    %7 = arith.maximumf %5, %6 : vector<8x32xf32>
    %c0_6 = arith.constant 0 : index
    %c0_7 = arith.constant 0 : index
    %8 = vector.load %arg4[%c0_6, %c0_7] : memref<32x32xf32, #tpu.memory_space<vmem>>, vector<32x32xf32>
    %cst_8 = arith.constant dense<0.000000e+00> : vector<8x32xf32>
    %9 = tpu.matmul %7, %8, %cst_8 {dimension_numbers = #tpu.dot_dimension_numbers<[1], [0], [0], [1], [0, 0, 1, 1], [], []>} : vector<8x32xf32>, vector<32x32xf32>, vector<8x32xf32> -> vector<8x32xf32>
    %c0_9 = arith.constant 0 : index
    %c0_10 = arith.constant 0 : index
    %10 = vector.load %arg5[%c0_9, %c0_10] : memref<1x32xf32, #tpu.memory_space<vmem>>, vector<1x32xf32>
    %11 = vector.broadcast %10 : vector<1x32xf32> to vector<8x32xf32>
    %12 = arith.addf %9, %11 : vector<8x32xf32>
    %13 = arith.addf %12, %0 : vector<8x32xf32>
    %c0_11 = arith.constant 0 : index
    %c0_12 = arith.constant 0 : index
    %14 = vector.load %arg6[%c0_11, %c0_12] : memref<8x32xf32, #tpu.memory_space<vmem>>, vector<8x32xf32>
    tpu.vector_store %arg6[%c0_11, %c0_12], %13 {strides = array<i32>} : memref<8x32xf32, #tpu.memory_space<vmem>>, vector<8x32xf32>,
    return
  }
  func.func @transform_0(%arg0: i32) -> (i32, i32) {
    %c0_i32 = arith.constant 0 : i32
    %c0_i32_0 = arith.constant 0 : i32
    return %arg0, %c0_i32 : i32, i32
  }
  func.func @transform_1(%arg0: i32) -> (i32, i32) {
    %c0_i32 = arith.constant 0 : i32
    %c0_i32_0 = arith.constant 0 : i32
    %c0_i32_1 = arith.constant 0 : i32
    return %c0_i32, %c0_i32_0 : i32, i32
  }
  func.func @transform_2(%arg0: i32) -> (i32, i32) {
    %c0_i32 = arith.constant 0 : i32
    %c0_i32_0 = arith.constant 0 : i32
    %c0_i32_1 = arith.constant 0 : i32
    return %c0_i32, %c0_i32_0 : i32, i32
  }
  func.func @transform_3(%arg0: i32) -> (i32, i32) {
    %c0_i32 = arith.constant 0 : i32
    %c0_i32_0 = arith.constant 0 : i32
    %c0_i32_1 = arith.constant 0 : i32
    return %c0_i32, %c0_i32_0 : i32, i32
  }
  func.func @transform_4(%arg0: i32) -> (i32, i32) {
    %c0_i32 = arith.constant 0 : i32
    %c0_i32_0 = arith.constant 0 : i32
    %c0_i32_1 = arith.constant 0 : i32
    return %c0_i32, %c0_i32_0 : i32, i32
  }
  func.func @transform_5(%arg0: i32) -> (i32, i32) {
    %c0_i32 = arith.constant 0 : i32
    %c0_i32_0 = arith.constant 0 : i32
    return %arg0, %c0_i32 : i32, i32
  }
}

</mosaic_0001>

<bundles_post_ra>
// kernel: tpu_custom_call.1
= control target key start
LH: loop header
LB: loop body
LE: loop exit
PB: predicated region body
PF: predicated region fallthrough
CT: control target
= control target key end

     0   :  { %10 = vsyncpa [#allocation3], 0  ;;  %s890_s0 = inlined_call_operand.hbm [shape: f32[16,32], index: 0, kind: input, shape index: {}]   ;;  %s891_s1 = inlined_call_operand.hbm [shape: f32[32,32], index: 1, kind: input, shape index: {}]   ;;  %s892_s2 = inlined_call_operand.vmem [shape: f32[1,32], index: 2, kind: input, shape index: {}]   ;;  %s893_s3 = inlined_call_operand.hbm [shape: f32[32,32], index: 3, kind: input, shape index: {}]   ;;  %s894_s4 = inlined_call_operand.vmem [shape: f32[1,32], index: 4, kind: input, shape index: {}]   ;;  %s895_s5 = inlined_call_operand.hbm [shape: f32[16,32], index: 5, kind: output, shape index: {}]  }
   0x1   :  { %12 = vsyncpa [#allocation3 + $0x1], 0 }
   0x2   :  { %13 = vsyncpa [#allocation6], 0 }
   0x3   :  { %14 = vsyncpa [#allocation4], 0 }
   0x4   :  { %16 = vsyncpa [#allocation4 + $0x1], 0  ;;  %s732_s18 = smov 0   ;;  %s734_s19 = smov 0  }
   0x5   :  { %s736_s20 = smov 0   ;;  %s738_s21 = smov 0  }
   0x6 LB: > { %s174_s24 = sshll.u32 %s891_s1, 4  ;;  %s756_s25 = sadd.s32 4294967295, %s696_s21   ;;  %s696_s21 = sphi %s738_s21, %s906_s21   ;;  %s692_s20 = sphi %s736_s20, %s905_s20   ;;  %s688_s19 = sphi %s734_s19, %s904_s19   ;;  %s684_s18 = sphi %s732_s18, %s903_s18   ;;  %s175_s24 = int_to_ptr.hbm [resolvable:$true] %s174_s24 }
   0x7   : > { %p448_p0 = scmp.ge.s32.totalorder %s696_s21, 1  ;;  %p43_p1 = scmp.eq.s32.totalorder %s756_s25, 0 }
   0x8   : > { %p163_p2 = scmp.lt.s32.totalorder %s696_s21, 3  ;;  %s698_s27 = smov [#allocation5]  }
   0x9   : > { %s176_s28 = sshll.u32 %s698_s27, 4  ;;  %s191_s6 = sshll.u32 %s893_s3, 4  ;;  %s177_s28 = int_to_ptr.vmem [resolvable:$true] %s176_s28  ;;  %s192_s6 = int_to_ptr.hbm [resolvable:$true] %s191_s6 }
   0xa   : > { %p761_p3 = pnand %p448_p0, %p163_p2  ;;  %s699_s7 = smov [#allocation7]  }
   0xb   : > { %s193_s8 = sshll.u32 %s699_s7, 4  ;;  %s700_s9 = smov 128   ;;  %s194_s8 = int_to_ptr.vmem [resolvable:$true] %s193_s8 }
   0xc   : > { %p477_p4 = pneg %p761_p3  ;;  %s701_s10 = smov 8  }
   0xd   : > { %s447_s11 = sadd.s32 4294967294, %s696_s21   ;;  %s775_s12 = sadd.s32 1, %s696_s21  }
   0xe   : > { %p478_p6 = pnand %p477_p4, %p43_p1  ;;  %s26_s13 = ssub.s32 %s696_s21, %s775_s12 }
   0xf   : > { %s29_s14 = sadd.s32 1, %s692_s20  ;;  %p27_p7 = scmp.eq.s32.totalorder %s26_s13, 0 }
  0x10   : > { %480 = dma.hbm_to_vmem [thread:$0]  (!%p478_p6), %s175_s24, 512, %s177_s28, [#allocation6], %s700_s9, %s700_s9, %s701_s10  }
  0x11   : > { %483 = dma.hbm_to_vmem [thread:$0]  (!%p478_p6), %s192_s6, 512, %s194_s8, [#allocation6], %s700_s9, %s700_s9, %s701_s10  }
  0x12   : > { %p36_p8 = scmp.ne.s32.totalorder %s692_s20, %s688_s19  ;;  %p37_p9 = scmp.eq.s32.totalorder %s696_s21, 0 }
  0x13   : > { %p42_p10 = scmp.ne.s32.totalorder %s688_s19, %s684_s18  ;;  %p150_p13 = scmp.eq.s32.totalorder %s756_s25, 1 }
  0x14   : > { %s786_s15 = scalar_select %p27_p7, %s692_s20, %s29_s14  }
  0x15   : > { %p788_p11 = por %p37_p9, %p36_p8  ;;  %p794_p12 = por %p43_p1, %p42_p10 }
  0x16   : > { %p156_p0 = scmp.eq.s32.totalorder %s447_s11, 1  ;;  %p494_p2 = scmp.lt.s32.totalorder %s696_s21, 2 }
  0x17   : > { %s210_s22 = sand.u32 1, %s692_s20   ;;  %p801_p4 = por %p150_p13, %p36_p8 }
  0x18   : > { %p805_p6 = por %p156_p0, %p42_p10  ;;  %s452_s27 = sshll.u32 %s210_s22, 3 }
  0x19   : > { %s453_s28 = sshll.u32 %s696_s21, 3  ;;  %s214_s7 = scalar_lea.vmem [#allocation2], %s452_s27 }
  0x1a   : > { %s218_s6 = scalar_lea.hbm %s890_s0, %s453_s28  ;;  %s222_s8 = sshll.u32 %s214_s7, 4  ;;  %s223_s8 = int_to_ptr.vmem [resolvable:$true] %s222_s8 }
  0x1b   : > { %s220_s9 = sshll.u32 %s218_s6, 4  ;;  %p815_p7 = pnand %p494_p2, %p788_p11  ;;  %s221_s9 = int_to_ptr.hbm [resolvable:$true] %s220_s9 }
  0x1c   : > { %s211_s11 = scalar_lea.sflag [#allocation3], %s210_s22  ;;  %s596_s13 = sshra.s32 %s221_s9, 4  ;;  %s597_s13 = int_to_ptr.hbm [resolvable:$true] %s596_s13 }
  0x1d   : > { %s598_s14 = scalar_lea.hbm %s597_s13, 8  ;;  %p600_p9 = pneg %p815_p7 }
  0x1e   : > { %p599_p8 = scmp.ne.s32.totalorder %s597_s13, %s598_s14  ;;  %s603_s29 = scalar_lea.hbm %s890_s0, 16 }
  0x1f   : > { %p604_p11 = scmp.lt.s32.totalorder %s597_s13, %s890_s0  ;;  %p605_p0 = scmp.lt.s32.totalorder %s603_s29, %s598_s14 }
  0x20   : > { %p601_p10 = pnand %p600_p9, %p599_p8 }
  0x21   : > { %p606_p2 = por %p605_p0, %p604_p11 }
  0x22   : > { %p602_p13 = pneg %p601_p10 }
  0x24   : > { %p607_p5 = pnand %p606_p2, %p602_p13 }
  0x26   : > { %610 = shalt.err (!%p607_p5)
}
  0x27   : > { %487 = dma.hbm_to_vmem [thread:$0]  (!%p815_p7), %s221_s9, 128, %s223_s8, %s211_s11  }
  0x28   : > { %231 = sbr.rel (%p761_p3) target bundleno = 319 (0x13f), region = 40  ;;  %s832_s22 = sand.u32 (!%p761_p3), 1, %s688_s19  }
  0x29   : > { %s455_s6 = sshll.u32 (!%p761_p3), %s832_s22, 3  ;;  %s234_s7 = scalar_lea.sflag (!%p761_p3), [#allocation3], %s832_s22 }
  0x2a   : > { %s237_s13 = scalar_lea.vmem (!%p761_p3), [#allocation2], %s455_s6 }
  0x2d   : > { %671 = dma.done.wait (%p794_p12), %s234_s7, 128  }
  0x2e   : > { %673 = vsyncadd (%p794_p12), %s234_s7, 4294967168 }
  0x2f   : > { %675 = dma.done.wait (%p43_p1), [#allocation6], 1024  }
  0x30   : > { %677 = vsyncadd (%p43_p1), [#allocation6], 4294966272  ;;  %v279_v0 = vld [vmem:[#allocation5 + $0x18] sm:$0xff]  ;;  %v278_v1 = vld [vmem:[#allocation5 + $0x10] sm:$0xff]  ;;  %vm284_vm0 = vcmask 261120   ;;  %s462_s8 = sshll.u32 %s756_s25, 3 }
  0x31   : > { %300 = vmatpush.msra.mxu0 %v279_v0  ;;  %v312_v2 = vld [vmem:[#allocation7 + $0x18] sm:$0xff]  ;;  %v277_v3 = vld [vmem:[#allocation5 + $0x8] sm:$0xff]  ;;  %v276_v4 = vld [vmem:[#allocation5] sm:$0xff]  ;;  %s353_s27 = scalar_lea.hbm %s895_s5, %s462_s8  ;;  %s274_s28 = scalar_lea.vmem [#allocation8], %s455_s6 }
  0x32   : > { %332 = vmatpush.msra.mxu1 %v312_v2  ;;  %v275_v5 = vld [vmem:[%s237_s13] sm:$0xff]  ;;  %v310_v7 = vld [vmem:[#allocation7 + $0x8] sm:$0xff]  ;;  %v309_v8 = vld [vmem:[#allocation7] sm:$0xff]  ;;  %s355_s29 = sshll.u32 %s274_s28, 4  ;;  %s357_s30 = sshll.u32 %s353_s27, 4  ;;  %s356_s29 = int_to_ptr.vmem [resolvable:$true] %s355_s29  ;;  %s358_s30 = int_to_ptr.hbm [resolvable:$true] %s357_s30 }
  0x33   : > { %301 = vmatpush.msra.mxu0 %v278_v1  ;;  %v311_v6 = vld [vmem:[#allocation7 + $0x10] sm:$0xff]  ;;  %s343_s25 = scalar_lea.sflag [#allocation4], %s832_s22  ;;  %s640_s16 = sshra.s32 %s358_s30, 4  ;;  %s641_s16 = int_to_ptr.hbm [resolvable:$true] %s640_s16 }
  0x34   : > { %333 = vmatpush.msra.mxu1 %v311_v6  ;;  %v534_v9 = vld [vmem:[%s892_s2] ss:$0 sm:$0xff]  ;;  %s642_s7 = scalar_lea.hbm %s641_s16, 8  ;;  %s646_s6 = scalar_lea.hbm %s895_s5, 16 }
  0x35   : > { %302 = vmatpush.msra.mxu0 %v277_v3  ;;  %v535_v13 = vld [vmem:[%s894_s4] ss:$0 sm:$0xff]  ;;  %p643_p1 = scmp.ne.s32.totalorder %s641_s16, %s642_s7  ;;  %p647_p12 = scmp.lt.s32.totalorder %s641_s16, %s895_s5 }
  0x36   : > { %334 = vmatpush.msra.mxu1 %v310_v7  ;;  %p648_p7 = scmp.lt.s32.totalorder %s646_s6, %s642_s7 }
  0x37   : > { %303 = vmatpush.msra.mxu0 %v276_v4  ;;  %p644_p3 = pnand %p643_p1, %p801_p4 }
  0x38   : > { %459 = vmatmul.msk.f32.vlgmr.msra.gmra.mxu0 %vm284_vm0, %v275_v5  ;;  %335 = vmatpush.msra.mxu1 %v309_v8  ;;  %p649_p8 = por %p648_p7, %p647_p12 }
  0x39   : > { %p645_p5 = pneg %p644_p3 }
  0x3b   : > { %p650_p9 = pnand %p649_p8, %p645_p5 }
  0xb5   : > { %v305_v10 = vpop.f32.mrf.mxu0 }
  0xb6   : > { %v306_v11 = vadd.f32 %v534_v9, %v305_v10 }
  0xb8   : > { %v308_v12 = vmax.f32 %v306_v11, 0.0 }
  0xba   : > { %460 = vmatmul.msk.f32.vlgmr.msra.gmra.mxu1 %vm284_vm0, %v308_v12 }
 0x137   : > { %v337_v14 = vpop.f32.mrf.mxu1 }
 0x138   : > { %v338_v15 = vadd.f32 %v535_v13, %v337_v14 }
 0x13a   : > { %v340_v16 = vadd.f32 %v338_v15, %v275_v5 }
 0x13c   : > { %341 = vst.msk [vmem:[%s274_s28] sm:$0xff] %vm284_vm0, %v340_v16 }
 0x13d   : > { %653 = shalt.err (!%p650_p9)
}
 0x13e   : > { %475 = dma.vmem_to_hbm [thread:$0]  (%p801_p4), %s356_s29, 128, %s358_s30, %s343_s25  }
 0x13f PF: > { %s369_s22 = sand.u32 1, %s684_s18   ;;  %p902_p10 = scmp.ge.s32.totalorder %s696_s21, 2 }
 0x140   : > { %s370_s9 = scalar_lea.sflag [#allocation4], %s369_s22 }
 0x141   : > { %p489_p13 = pnand %p902_p10, %p805_p6 }
 0x143   : > { %p490_p11 = pneg %p489_p13 }
 0x145   : > { %679 = dma.done.wait (%p490_p11), %s370_s9, 128  }
 0x146   : > { %681 = vsyncadd (%p490_p11), %s370_s9, 4294967168  ;;  %p19_p0 = scmp.ge.s32.totalorder %s775_s12, 4   ;;  %s903_s18 = smov %s688_s19 }
 0x147   : > { %s904_s19 = smov %s692_s20  ;;  %s905_s20 = smov %s786_s15 }
 0x148   : > { %s906_s21 = smov %s775_s12  ;;  %21 = sbr.rel (!%p19_p0) target bundleno = 6 (0x6), region = 93 }
 0x14d   :  { %376 = vsyncpa [#allocation3], 1 }
 0x14e   :  { %378 = vsyncpa [#allocation3 + $0x1], 1 }
 0x14f   :  { %379 = vsyncpa [#allocation6], 1 }
 0x150   :  { %380 = vsyncpa [#allocation4], 1 }
 0x151   :  { %382 = vsyncpa [#allocation4 + $0x1], 1 }

// kernel: tpu_custom_call.1
= control target key start
LH: loop header
LB: loop body
LE: loop exit
PB: predicated region body
PF: predicated region fallthrough
CT: control target
= control target key end

     0   :  { %10 = vsyncpa [#allocation3], 0  ;;  %s890_s0 = inlined_call_operand.hbm [shape: f32[16,32], index: 0, kind: input, shape index: {}]   ;;  %s891_s1 = inlined_call_operand.hbm [shape: f32[32,32], index: 1, kind: input, shape index: {}]   ;;  %s892_s2 = inlined_call_operand.vmem [shape: f32[1,32], index: 2, kind: input, shape index: {}]   ;;  %s893_s3 = inlined_call_operand.hbm [shape: f32[32,32], index: 3, kind: input, shape index: {}]   ;;  %s894_s4 = inlined_call_operand.vmem [shape: f32[1,32], index: 4, kind: input, shape index: {}]   ;;  %s895_s5 = inlined_call_operand.hbm [shape: f32[16,32], index: 5, kind: output, shape index: {}]  }
   0x1   :  { %12 = vsyncpa [#allocation3 + $0x1], 0 }
   0x2   :  { %13 = vsyncpa [#allocation6], 0 }
   0x3   :  { %14 = vsyncpa [#allocation4], 0 }
   0x4   :  { %16 = vsyncpa [#allocation4 + $0x1], 0  ;;  %s732_s18 = smov 0   ;;  %s734_s19 = smov 0  }
   0x5   :  { %s736_s20 = smov 0   ;;  %s738_s21 = smov 0  }
   0x6 LB: > { %s174_s24 = sshll.u32 %s891_s1, 4  ;;  %s756_s25 = sadd.s32 4294967295, %s696_s21   ;;  %s696_s21 = sphi %s738_s21, %s906_s21   ;;  %s692_s20 = sphi %s736_s20, %s905_s20   ;;  %s688_s19 = sphi %s734_s19, %s904_s19   ;;  %s684_s18 = sphi %s732_s18, %s903_s18   ;;  %s175_s24 = int_to_ptr.hbm [resolvable:$true] %s174_s24 }
   0x7   : > { %p448_p0 = scmp.ge.s32.totalorder %s696_s21, 1  ;;  %p43_p1 = scmp.eq.s32.totalorder %s756_s25, 0 }
   0x8   : > { %p163_p2 = scmp.lt.s32.totalorder %s696_s21, 3  ;;  %s698_s27 = smov [#allocation5]  }
   0x9   : > { %s176_s28 = sshll.u32 %s698_s27, 4  ;;  %s191_s6 = sshll.u32 %s893_s3, 4  ;;  %s177_s28 = int_to_ptr.vmem [resolvable:$true] %s176_s28  ;;  %s192_s6 = int_to_ptr.hbm [resolvable:$true] %s191_s6 }
   0xa   : > { %p761_p3 = pnand %p448_p0, %p163_p2  ;;  %s699_s7 = smov [#allocation7]  }
   0xb   : > { %s193_s8 = sshll.u32 %s699_s7, 4  ;;  %s700_s9 = smov 128   ;;  %s194_s8 = int_to_ptr.vmem [resolvable:$true] %s193_s8 }
   0xc   : > { %p477_p4 = pneg %p761_p3  ;;  %s701_s10 = smov 8  }
   0xd   : > { %s447_s11 = sadd.s32 4294967294, %s696_s21   ;;  %s775_s12 = sadd.s32 1, %s696_s21  }
   0xe   : > { %p478_p6 = pnand %p477_p4, %p43_p1  ;;  %s26_s13 = ssub.s32 %s696_s21, %s775_s12 }
   0xf   : > { %s29_s14 = sadd.s32 1, %s692_s20  ;;  %p27_p7 = scmp.eq.s32.totalorder %s26_s13, 0 }
  0x10   : > { %480 = dma.hbm_to_vmem [thread:$0]  (!%p478_p6), %s175_s24, 512, %s177_s28, [#allocation6], %s700_s9, %s700_s9, %s701_s10  }
  0x11   : > { %483 = dma.hbm_to_vmem [thread:$0]  (!%p478_p6), %s192_s6, 512, %s194_s8, [#allocation6], %s700_s9, %s700_s9, %s701_s10  }
  0x12   : > { %p36_p8 = scmp.ne.s32.totalorder %s692_s20, %s688_s19  ;;  %p37_p9 = scmp.eq.s32.totalorder %s696_s21, 0 }
  0x13   : > { %p42_p10 = scmp.ne.s32.totalorder %s688_s19, %s684_s18  ;;  %p150_p13 = scmp.eq.s32.totalorder %s756_s25, 1 }
  0x14   : > { %s786_s15 = scalar_select %p27_p7, %s692_s20, %s29_s14  }
  0x15   : > { %p788_p11 = por %p37_p9, %p36_p8  ;;  %p794_p12 = por %p43_p1, %p42_p10 }
  0x16   : > { %p156_p0 = scmp.eq.s32.totalorder %s447_s11, 1  ;;  %p494_p2 = scmp.lt.s32.totalorder %s696_s21, 2 }
  0x17   : > { %s210_s22 = sand.u32 1, %s692_s20   ;;  %p801_p4 = por %p150_p13, %p36_p8 }
  0x18   : > { %p805_p6 = por %p156_p0, %p42_p10  ;;  %s452_s27 = sshll.u32 %s210_s22, 3 }
  0x19   : > { %s453_s28 = sshll.u32 %s696_s21, 3  ;;  %s214_s7 = scalar_lea.vmem [#allocation2], %s452_s27 }
  0x1a   : > { %s218_s6 = scalar_lea.hbm %s890_s0, %s453_s28  ;;  %s222_s8 = sshll.u32 %s214_s7, 4  ;;  %s223_s8 = int_to_ptr.vmem [resolvable:$true] %s222_s8 }
  0x1b   : > { %s220_s9 = sshll.u32 %s218_s6, 4  ;;  %p815_p7 = pnand %p494_p2, %p788_p11  ;;  %s221_s9 = int_to_ptr.hbm [resolvable:$true] %s220_s9 }
  0x1c   : > { %s211_s11 = scalar_lea.sflag [#allocation3], %s210_s22  ;;  %s596_s13 = sshra.s32 %s221_s9, 4  ;;  %s597_s13 = int_to_ptr.hbm [resolvable:$true] %s596_s13 }
  0x1d   : > { %s598_s14 = scalar_lea.hbm %s597_s13, 8  ;;  %p600_p9 = pneg %p815_p7 }
  0x1e   : > { %p599_p8 = scmp.ne.s32.totalorder %s597_s13, %s598_s14  ;;  %s603_s29 = scalar_lea.hbm %s890_s0, 16 }
  0x1f   : > { %p604_p11 = scmp.lt.s32.totalorder %s597_s13, %s890_s0  ;;  %p605_p0 = scmp.lt.s32.totalorder %s603_s29, %s598_s14 }
  0x20   : > { %p601_p10 = pnand %p600_p9, %p599_p8 }
  0x21   : > { %p606_p2 = por %p605_p0, %p604_p11 }
  0x22   : > { %p602_p13 = pneg %p601_p10 }
  0x24   : > { %p607_p5 = pnand %p606_p2, %p602_p13 }
  0x26   : > { %610 = shalt.err (!%p607_p5)
}
  0x27   : > { %487 = dma.hbm_to_vmem [thread:$0]  (!%p815_p7), %s221_s9, 128, %s223_s8, %s211_s11  }
  0x28   : > { %231 = sbr.rel (%p761_p3) target bundleno = 319 (0x13f), region = 40  ;;  %s832_s22 = sand.u32 (!%p761_p3), 1, %s688_s19  }
  0x29   : > { %s455_s6 = sshll.u32 (!%p761_p3), %s832_s22, 3  ;;  %s234_s7 = scalar_lea.sflag (!%p761_p3), [#allocation3], %s832_s22 }
  0x2a   : > { %s237_s13 = scalar_lea.vmem (!%p761_p3), [#allocation2], %s455_s6 }
  0x2d   : > { %671 = dma.done.wait (%p794_p12), %s234_s7, 128  }
  0x2e   : > { %673 = vsyncadd (%p794_p12), %s234_s7, 4294967168 }
  0x2f   : > { %675 = dma.done.wait (%p43_p1), [#allocation6], 1024  }
  0x30   : > { %677 = vsyncadd (%p43_p1), [#allocation6], 4294966272  ;;  %v279_v0 = vld [vmem:[#allocation5 + $0x18] sm:$0xff]  ;;  %v278_v1 = vld [vmem:[#allocation5 + $0x10] sm:$0xff]  ;;  %vm284_vm0 = vcmask 261120   ;;  %s462_s8 = sshll.u32 %s756_s25, 3 }
  0x31   : > { %300 = vmatpush.msra.mxu0 %v279_v0  ;;  %v312_v2 = vld [vmem:[#allocation7 + $0x18] sm:$0xff]  ;;  %v277_v3 = vld [vmem:[#allocation5 + $0x8] sm:$0xff]  ;;  %v276_v4 = vld [vmem:[#allocation5] sm:$0xff]  ;;  %s353_s27 = scalar_lea.hbm %s895_s5, %s462_s8  ;;  %s274_s28 = scalar_lea.vmem [#allocation8], %s455_s6 }
  0x32   : > { %332 = vmatpush.msra.mxu1 %v312_v2  ;;  %v275_v5 = vld [vmem:[%s237_s13] sm:$0xff]  ;;  %v310_v7 = vld [vmem:[#allocation7 + $0x8] sm:$0xff]  ;;  %v309_v8 = vld [vmem:[#allocation7] sm:$0xff]  ;;  %s355_s29 = sshll.u32 %s274_s28, 4  ;;  %s357_s30 = sshll.u32 %s353_s27, 4  ;;  %s356_s29 = int_to_ptr.vmem [resolvable:$true] %s355_s29  ;;  %s358_s30 = int_to_ptr.hbm [resolvable:$true] %s357_s30 }
  0x33   : > { %301 = vmatpush.msra.mxu0 %v278_v1  ;;  %v311_v6 = vld [vmem:[#allocation7 + $0x10] sm:$0xff]  ;;  %s343_s25 = scalar_lea.sflag [#allocation4], %s832_s22  ;;  %s640_s16 = sshra.s32 %s358_s30, 4  ;;  %s641_s16 = int_to_ptr.hbm [resolvable:$true] %s640_s16 }
  0x34   : > { %333 = vmatpush.msra.mxu1 %v311_v6  ;;  %v534_v9 = vld [vmem:[%s892_s2] ss:$0 sm:$0xff]  ;;  %s642_s7 = scalar_lea.hbm %s641_s16, 8  ;;  %s646_s6 = scalar_lea.hbm %s895_s5, 16 }
  0x35   : > { %302 = vmatpush.msra.mxu0 %v277_v3  ;;  %v535_v13 = vld [vmem:[%s894_s4] ss:$0 sm:$0xff]  ;;  %p643_p1 = scmp.ne.s32.totalorder %s641_s16, %s642_s7  ;;  %p647_p12 = scmp.lt.s32.totalorder %s641_s16, %s895_s5 }
  0x36   : > { %334 = vmatpush.msra.mxu1 %v310_v7  ;;  %p648_p7 = scmp.lt.s32.totalorder %s646_s6, %s642_s7 }
  0x37   : > { %303 = vmatpush.msra.mxu0 %v276_v4  ;;  %p644_p3 = pnand %p643_p1, %p801_p4 }
  0x38   : > { %459 = vmatmul.msk.f32.vlgmr.msra.gmra.mxu0 %vm284_vm0, %v275_v5  ;;  %335 = vmatpush.msra.mxu1 %v309_v8  ;;  %p649_p8 = por %p648_p7, %p647_p12 }
  0x39   : > { %p645_p5 = pneg %p644_p3 }
  0x3b   : > { %p650_p9 = pnand %p649_p8, %p645_p5 }
  0xb5   : > { %v305_v10 = vpop.f32.mrf.mxu0 }
  0xb6   : > { %v306_v11 = vadd.f32 %v534_v9, %v305_v10 }
  0xb8   : > { %v308_v12 = vmax.f32 %v306_v11, 0.0 }
  0xba   : > { %460 = vmatmul.msk.f32.vlgmr.msra.gmra.mxu1 %vm284_vm0, %v308_v12 }
 0x137   : > { %v337_v14 = vpop.f32.mrf.mxu1 }
 0x138   : > { %v338_v15 = vadd.f32 %v535_v13, %v337_v14 }
 0x13a   : > { %v340_v16 = vadd.f32 %v338_v15, %v275_v5 }
 0x13c   : > { %341 = vst.msk [vmem:[%s274_s28] sm:$0xff] %vm284_vm0, %v340_v16 }
 0x13d   : > { %653 = shalt.err (!%p650_p9)
}
 0x13e   : > { %475 = dma.vmem_to_hbm [thread:$0]  (%p801_p4), %s356_s29, 128, %s358_s30, %s343_s25  }
 0x13f PF: > { %s369_s22 = sand.u32 1, %s684_s18   ;;  %p902_p10 = scmp.ge.s32.totalorder %s696_s21, 2 }
 0x140   : > { %s370_s9 = scalar_lea.sflag [#allocation4], %s369_s22 }
 0x141   : > { %p489_p13 = pnand %p902_p10, %p805_p6 }
 0x143   : > { %p490_p11 = pneg %p489_p13 }
 0x145   : > { %679 = dma.done.wait (%p490_p11), %s370_s9, 128  }
 0x146   : > { %681 = vsyncadd (%p490_p11), %s370_s9, 4294967168  ;;  %p19_p0 = scmp.ge.s32.totalorder %s775_s12, 4   ;;  %s903_s18 = smov %s688_s19 }
 0x147   : > { %s904_s19 = smov %s692_s20  ;;  %s905_s20 = smov %s786_s15 }
 0x148   : > { %s906_s21 = smov %s775_s12  ;;  %21 = sbr.rel (!%p19_p0) target bundleno = 6 (0x6), region = 93 }
 0x14d   :  { %376 = vsyncpa [#allocation3], 1 }
 0x14e   :  { %378 = vsyncpa [#allocation3 + $0x1], 1 }
 0x14f   :  { %379 = vsyncpa [#allocation6], 1 }
 0x150   :  { %380 = vsyncpa [#allocation4], 1 }
 0x151   :  { %382 = vsyncpa [#allocation4 + $0x1], 1 }

</bundles_post_ra>
